<compile_context>
chip_gen: v6e
topology: v6e:2x2x1
jax: 0.10.0
libtpu: 0.0.40
codegen_flags: <defaults>
</compile_context>

<pallas_src>
import functools

import jax
import jax.numpy as jnp
from jax.experimental import pallas as pl
from jax.experimental.pallas import tpu as pltpu

LANES = 128
SUBLANES = 8
# ~4 MiB per input per pipeline buffer: 2 inputs x 2 buffers = 16 MiB VMEM.
BYTES_PER_INPUT_PER_BUFFER = 4 * 1024 * 1024
VMEM_LIMIT_BYTES = 40 * 1024 * 1024  # > 16 MiB needed; < 64 MiB v7x physical.


def _round_up(x, m):
    return ((x + m - 1) // m) * m


def _num_tensorcores():
    # Only v7x has 2 TensorCores per chip.  device_kind is only used for this
    # core-count decision; tile sizing is byte-budget based (dtype aware).
    try:
        kind = jax.devices()[0].device_kind.lower()
    except Exception:
        return 1
    return 2 if "v7" in kind else 1


def _mae_kernel(p_ref, t_ref, o_ref, *, rows, row_tile, steps_per_split,
                need_mask):
    """Accumulate sum(|p - t|) of one (row_tile, 128) tile into o_ref (8,128)."""
    @pl.when(pl.program_id(1) == 0)
    def _():
        o_ref[...] = jnp.zeros_like(o_ref)

    x = jnp.abs(p_ref[...].astype(jnp.float32) -
                t_ref[...].astype(jnp.float32))

    def _accumulate(v):
        # (row_tile,128) -> (row_tile//8, 8, 128); summing axis 0 is pure vreg
        # adds (VPU) that hide under the DMA of the next tile.
        o_ref[...] += v.reshape(-1, SUBLANES, LANES).sum(axis=0)

    if need_mask:
        # Logical (unclamped) block index; limit = #valid rows in this tile.
        b = pl.program_id(0) * steps_per_split + pl.program_id(1)
        limit = rows - b * row_tile

        @pl.when(limit >= row_tile)          # full tile: no mask work at all
        def _():
            _accumulate(x)

        @pl.when(limit < row_tile)           # ragged or out-of-range tile
        def _():
            row_idx = jax.lax.broadcasted_iota(jnp.int32, x.shape, 0)
            _accumulate(jnp.where(row_idx < limit, x, 0.0))
    else:
        _accumulate(x)


def _mae_partial_sums(p2d, t2d, rows, num_cores):
    """Pallas streaming |diff| reduce over a (rows, 128) lane-dense slab."""
    itemsize = max(p2d.dtype.itemsize, t2d.dtype.itemsize)
    budget_rows = max(SUBLANES, BYTES_PER_INPUT_PER_BUFFER // (LANES * itemsize))
    budget_rows -= budget_rows % SUBLANES
    row_tile = min(budget_rows, _round_up(rows, SUBLANES))

    total_blocks = pl.cdiv(rows, row_tile)
    num_splits = num_cores if total_blocks >= num_cores else 1
    steps_per_split = pl.cdiv(total_blocks, num_splits)
    need_mask = (rows % row_tile != 0) or (num_splits * steps_per_split != total_blocks)

    def in_map(c, i):
        # Clamp so the DMA never starts past the array; out-of-range logical
        # blocks of the second split are zeroed by the gated in-kernel mask.
        return (jnp.minimum(c * steps_per_split + i, total_blocks - 1), 0)

    if num_splits > 1:
        # On v7x, only CORE_PARALLEL actually shards the axis across the two
        # TensorCores (plain "parallel" changes nothing in codegen).
        lead = getattr(pltpu, "CORE_PARALLEL", pltpu.PARALLEL)
    else:
        lead = pltpu.ARBITRARY

    kernel = functools.partial(
        _mae_kernel, rows=rows, row_tile=row_tile,
        steps_per_split=steps_per_split, need_mask=need_mask)

    return pl.pallas_call(
        kernel,
        out_shape=jax.ShapeDtypeStruct((num_splits, SUBLANES, LANES), jnp.float32),
        grid=(num_splits, steps_per_split),
        in_specs=[
            pl.BlockSpec((row_tile, LANES), in_map),
            pl.BlockSpec((row_tile, LANES), in_map),
        ],
        out_specs=pl.BlockSpec((None, SUBLANES, LANES), lambda c, i: (c, 0, 0)),
        compiler_params=pltpu.CompilerParams(
            dimension_semantics=(lead, pltpu.ARBITRARY),
            vmem_limit_bytes=VMEM_LIMIT_BYTES,
        ),
    )(p2d, t2d)


def mae_loss(y_pred, y_true):
    """Mean absolute error over all elements (== torch.nn.L1Loss()(pred, true))."""
    assert y_pred.shape == y_true.shape, "L1Loss requires matching shapes"
    n_elems = y_pred.size
    if n_elems == 0:
        return jnp.float32(jnp.nan)  # matches torch.nn.L1Loss on empty input

    p = jnp.ravel(y_pred)
    t = jnp.ravel(y_true)

    rows = n_elems // LANES
    tail = n_elems - rows * LANES

    if rows == 0:
        # Fewer than 128 elements: not worth a kernel launch.
        return jnp.mean(jnp.abs(p.astype(jnp.float32) - t.astype(jnp.float32)))

    if tail == 0:
        p2d = p.reshape(rows, LANES)   # free bitcast, no extra HBM pass
        t2d = t.reshape(rows, LANES)
    else:
        # Lane-aligned prefix through the kernel; the <128-element tail is
        # summed in plain JAX (avoids a full-array jnp.pad copy).
        p2d = p[: rows * LANES].reshape(rows, LANES)
        t2d = t[: rows * LANES].reshape(rows, LANES)

    partials = _mae_partial_sums(p2d, t2d, rows, _num_tensorcores())
    total = jnp.sum(partials)

    if tail != 0:
        total = total + jnp.sum(
            jnp.abs(p[rows * LANES:].astype(jnp.float32) -
                    t[rows * LANES:].astype(jnp.float32)))

    return total / jnp.float32(n_elems)


if __name__ == "__main__":
    key = jax.random.PRNGKey(0)
    k1, k2 = jax.random.split(key)
    # Small NCHW-shaped prediction/target pair (image-regression style loss).
    x_shape = (2, 4, 16, 16)
    y_pred = jax.random.normal(k1, x_shape, dtype=jnp.float32)
    y_true = jax.random.normal(k2, x_shape, dtype=jnp.float32)

    loss = jax.block_until_ready(mae_loss(y_pred, y_true))

    # Sanity check against plain-JAX reference (same semantics as nn.L1Loss).
    ref = jnp.mean(jnp.abs(y_pred - y_true))
    assert jnp.allclose(loss, ref, rtol=1e-6, atol=1e-6), (loss, ref)

    print("KERNEL_OK")
</pallas_src>

<mosaic_0001>
module attributes {stable_mosaic.version = 11 : i64} {
  func.func @_mae_kernel(%arg0: i32, %arg1: i32, %arg2: memref<16x128xf32, #tpu.memory_space<vmem>>, %arg3: memref<16x128xf32, #tpu.memory_space<vmem>>, %arg4: memref<1x8x128xf32, #tpu.memory_space<vmem>>) attributes {dimension_semantics = [#tpu.dimension_semantics<arbitrary>, #tpu.dimension_semantics<arbitrary>], iteration_bounds = array<i64: 1, 1>, scalar_prefetch = 0 : i64, scratch_operands = 0 : i64, tpu.core_type = #tpu.core_type<tc>, window_params = [{transform_indices = @transform_0, window_bounds = array<i64: 16, 128>}, {transform_indices = @transform_1, window_bounds = array<i64: 16, 128>}, {transform_indices = @transform_2, window_bounds = array<i64: 1, 8, 128>}]} {
    %c0_i32 = arith.constant 0 : i32
    %0 = arith.cmpi eq, %arg1, %c0_i32 : i32
    %1 = arith.extui %0 : i1 to i32
    %c0_i32_0 = arith.constant 0 : i32
    %2 = arith.cmpi ne, %1, %c0_i32_0 : i32
    scf.if %2 {
      %cst_10 = arith.constant 0.000000e+00 : f32
      %15 = vector.broadcast %cst_10 : f32 to vector<8x128xf32>
      %c0_11 = arith.constant 0 : index
      %c0_12 = arith.constant 0 : index
      %c0_13 = arith.constant 0 : index
      %16 = vector.load %arg4[%c0_11, %c0_12, %c0_13] : memref<1x8x128xf32, #tpu.memory_space<vmem>>, vector<1x8x128xf32>
      %17 = vector.shape_cast %16 : vector<1x8x128xf32> to vector<8x128xf32>
      %18 = vector.shape_cast %15 : vector<8x128xf32> to vector<1x8x128xf32>
      tpu.vector_store %arg4[%c0_11, %c0_12, %c0_13], %18 {strides = array<i32>} : memref<1x8x128xf32, #tpu.memory_space<vmem>>, vector<1x8x128xf32>,
    } else {
    }
    %c0 = arith.constant 0 : index
    %c0_1 = arith.constant 0 : index
    %3 = vector.load %arg2[%c0, %c0_1] : memref<16x128xf32, #tpu.memory_space<vmem>>, vector<16x128xf32>
    %c0_2 = arith.constant 0 : index
    %c0_3 = arith.constant 0 : index
    %4 = vector.load %arg3[%c0_2, %c0_3] : memref<16x128xf32, #tpu.memory_space<vmem>>, vector<16x128xf32>
    %5 = arith.subf %3, %4 : vector<16x128xf32>
    %6 = math.absf %5 : vector<16x128xf32>
    %c0_4 = arith.constant 0 : index
    %c0_5 = arith.constant 0 : index
    %c0_6 = arith.constant 0 : index
    %7 = vector.load %arg4[%c0_4, %c0_5, %c0_6] : memref<1x8x128xf32, #tpu.memory_space<vmem>>, vector<1x8x128xf32>
    %8 = vector.shape_cast %7 : vector<1x8x128xf32> to vector<8x128xf32>
    %9 = vector.shape_cast %6 : vector<16x128xf32> to vector<2x8x128xf32>
    %cst = arith.constant dense<0.000000e+00> : vector<8x128xf32>
    %10 = vector.multi_reduction <add>, %9, %cst [0] : vector<2x8x128xf32> to vector<8x128xf32>
    %11 = arith.addf %8, %10 : vector<8x128xf32>
    %c0_7 = arith.constant 0 : index
    %c0_8 = arith.constant 0 : index
    %c0_9 = arith.constant 0 : index
    %12 = vector.load %arg4[%c0_7, %c0_8, %c0_9] : memref<1x8x128xf32, #tpu.memory_space<vmem>>, vector<1x8x128xf32>
    %13 = vector.shape_cast %12 : vector<1x8x128xf32> to vector<8x128xf32>
    %14 = vector.shape_cast %11 : vector<8x128xf32> to vector<1x8x128xf32>
    tpu.vector_store %arg4[%c0_7, %c0_8, %c0_9], %14 {strides = array<i32>} : memref<1x8x128xf32, #tpu.memory_space<vmem>>, vector<1x8x128xf32>,
    return
  }
  func.func @transform_0(%arg0: i32, %arg1: i32) -> (i32, i32) {
    %c1_i32 = arith.constant 1 : i32
    %0 = arith.muli %arg0, %c1_i32 : i32
    %1 = arith.addi %0, %arg1 : i32
    %c0_i32 = arith.constant 0 : i32
    %2 = arith.minsi %1, %c0_i32 : i32
    %c0_i32_0 = arith.constant 0 : i32
    %c0_i32_1 = arith.constant 0 : i32
    return %2, %c0_i32_0 : i32, i32
  }
  func.func @transform_1(%arg0: i32, %arg1: i32) -> (i32, i32) {
    %c1_i32 = arith.constant 1 : i32
    %0 = arith.muli %arg0, %c1_i32 : i32
    %1 = arith.addi %0, %arg1 : i32
    %c0_i32 = arith.constant 0 : i32
    %2 = arith.minsi %1, %c0_i32 : i32
    %c0_i32_0 = arith.constant 0 : i32
    %c0_i32_1 = arith.constant 0 : i32
    return %2, %c0_i32_0 : i32, i32
  }
  func.func @transform_2(%arg0: i32, %arg1: i32) -> (i32, i32, i32) {
    %c0_i32 = arith.constant 0 : i32
    %c0_i32_0 = arith.constant 0 : i32
    %c0_i32_1 = arith.constant 0 : i32
    return %arg0, %c0_i32, %c0_i32_0 : i32, i32, i32
  }
}

</mosaic_0001>

<bundles_post_ra>
// kernel: tpu_custom_call.1
= control target key start
LH: loop header
LB: loop body
LE: loop exit
PB: predicated region body
PF: predicated region fallthrough
CT: control target
= control target key end

     0   :  { %7 = vsyncpa [#allocation3], 0  ;;  %s198_s0 = inlined_call_operand.hbm [shape: f32[16,128], index: 0, kind: input, shape index: {}]   ;;  %s199_s1 = inlined_call_operand.hbm [shape: f32[16,128], index: 1, kind: input, shape index: {}]   ;;  %s200_s2 = inlined_call_operand.hbm [shape: f32[1,8,128], index: 2, kind: output, shape index: {}]  }
   0x1   :  { %8 = vsyncpa [#allocation6], 0 }
   0x2   :  { %9 = vsyncpa [#allocation4], 0  ;;  %s169_s9 = smov [#allocation2]  }
   0x3   :  { %s21_s10 = sshll.u32 %s169_s9, 4  ;;  %s22_s10 = int_to_ptr.vmem [resolvable:$true] %s21_s10 }
   0x4   :  { %s111_s11 = scalar_lea.vmem %s22_s10, 256  ;;  %p116_p1 = scmp.lt.s32.totalorder %s22_s10, %s22_s10 }
   0x5   :  { %p112_p0 = scmp.ne.s32.totalorder %s22_s10, %s111_s11  ;;  %p117_p2 = scmp.lt.s32.totalorder %s111_s11, %s111_s11 }
   0x7   :  { %p118_p3 = por %p117_p2, %p116_p1 }
   0x9   :  { %p119_p4 = pnand %p118_p3, %p112_p0 }
   0xb   :  { %122 = shalt.err (!%p119_p4)
}
   0xc   :  { %s170_s12 = smov 128   ;;  %s171_s13 = smov 8  }
   0xd   :  { %27 = dma.hbm_to_vmem [thread:$0]  %s198_s0, 256, %s22_s10, [#allocation3], %s170_s12, %s170_s12, %s171_s13  }
   0xe   :  { %s172_s16 = smov [#allocation5]  }
   0xf   :  { %s39_s17 = sshll.u32 %s172_s16, 4  ;;  %s40_s17 = int_to_ptr.vmem [resolvable:$true] %s39_s17 }
  0x10   :  { %s131_s18 = scalar_lea.vmem %s40_s17, 256  ;;  %p136_p6 = scmp.lt.s32.totalorder %s40_s17, %s40_s17 }
  0x11   :  { %p132_p5 = scmp.ne.s32.totalorder %s40_s17, %s131_s18  ;;  %p137_p7 = scmp.lt.s32.totalorder %s131_s18, %s131_s18 }
  0x13   :  { %p138_p8 = por %p137_p7, %p136_p6 }
  0x15   :  { %p139_p9 = pnand %p138_p8, %p132_p5 }
  0x17   :  { %142 = shalt.err (!%p139_p9)
}
  0x18   :  { %45 = dma.hbm_to_vmem [thread:$0]  %s199_s1, 256, %s40_s17, [#allocation6], %s170_s12, %s170_s12, %s171_s13  }
  0x19   :  { %163 = dma.done.wait [#allocation3], 256  }
  0x1a   :  { %164 = vsyncadd [#allocation3], 4294967040 }
  0x1b   :  { %165 = dma.done.wait [#allocation6], 256  }
  0x1c   :  { %166 = vsyncadd [#allocation6], 4294967040  ;;  %v65_v0 = vld [vmem:[#allocation2] sm:$0xff]  ;;  %v66_v1 = vld [vmem:[#allocation2 + $0x8] sm:$0xff]  ;;  %s173_s0 = smov [#allocation7]  }
  0x1d   :  { %v67_v2 = vld [vmem:[#allocation5] sm:$0xff]  ;;  %v68_v3 = vld [vmem:[#allocation5 + $0x8] sm:$0xff]  ;;  %s83_s21 = sshll.u32 %s173_s0, 4  ;;  %s84_s21 = int_to_ptr.vmem [resolvable:$true] %s83_s21 }
  0x1e   :  { %v69_v4 = vsub.f32 %v65_v0, %v67_v2  ;;  %v70_v5 = vsub.f32 %v66_v1, %v68_v3  ;;  %s143_s22 = scalar_lea.vmem %s84_s21, 128  ;;  %p148_p11 = scmp.lt.s32.totalorder %s84_s21, %s84_s21 }
  0x1f   :  { %p144_p10 = scmp.ne.s32.totalorder %s84_s21, %s143_s22  ;;  %p149_p12 = scmp.lt.s32.totalorder %s143_s22, %s143_s22 }
  0x20   :  { %v71_v6 = vand.u32 2147483647, %v69_v4  ;;  %v72_v7 = vand.u32 2147483647, %v70_v5 }
  0x21   :  { %p150_p13 = por %p149_p12, %p148_p11 }
  0x22   :  { %v74_v8 = vadd.f32 %v72_v7, %v71_v6 }
  0x23   :  { %p151_p0 = pnand %p150_p13, %p144_p10 }
  0x24   :  { %76 = vst [vmem:[#allocation7] sm:$0xff] %v74_v8 }
  0x25   :  { %154 = shalt.err (!%p151_p0)
}
  0x26   :  { %86 = dma.vmem_to_hbm [thread:$0]  %s84_s21, 128, %s200_s2, [#allocation4]  }
  0x27   :  { %167 = dma.done.wait [#allocation4], 128  }
  0x28   :  { %168 = vsyncadd [#allocation4], 4294967168 }
  0x29   :  { %90 = vsyncpa [#allocation3], 1 }
  0x2a   :  { %91 = vsyncpa [#allocation6], 1 }
  0x2b   :  { %92 = vsyncpa [#allocation4], 1 }

</bundles_post_ra>
